<compile_context>
chip_gen: v5e
topology: v5e:2x2
jax: 0.10.0
libtpu: 0.0.40
codegen_flags: <defaults>
</compile_context>

<pallas_src>
import functools

import jax
import jax.numpy as jnp
from jax.experimental import pallas as pl
from jax.experimental.pallas import tpu as pltpu


def _ntxent_denominator_kernel(qidx_ref, kidx_ref,
                               zi_q_ref, zj_q_ref, zi_k_ref, zj_k_ref,
                               out_ref, *, n_tiles):
    """Grid point p handles the upper-triangular block pair (qi, ki), qi <= ki.

    out_ref is a resident (2*n_tiles, t) f32 accumulator of
    sum_c exp(sim[r, c] / T) (including self terms and padded columns, which
    are corrected exactly in the wrapper).  Rows [0, n_tiles) hold the zi-row
    half, rows [n_tiles, 2*n_tiles) the zj-row half.
    """
    p = pl.program_id(0)
    qi = qidx_ref[p]
    ki = kidx_ref[p]

    @pl.when(p == 0)
    def _init():
        out_ref[...] = jnp.zeros_like(out_ref)

    f32 = jnp.float32
    # A . B^T without materializing a transpose: contract dim 1 of both.
    dn = (((1,), (1,)), ((), ()))

    zi_q = zi_q_ref[...]
    zj_q = zj_q_ref[...]
    zi_k = zi_k_ref[...]
    zj_k = zj_k_ref[...]

    # Four quadrant tiles of exp(sim / T).  Inputs are pre-scaled by sqrt(1/T)
    # in the wrapper, so the MXU output is already sim / T.
    e_ii = jnp.exp(jax.lax.dot_general(zi_q, zi_k, dn, preferred_element_type=f32))
    e_ij = jnp.exp(jax.lax.dot_general(zi_q, zj_k, dn, preferred_element_type=f32))
    e_ji = jnp.exp(jax.lax.dot_general(zj_q, zi_k, dn, preferred_element_type=f32))
    e_jj = jnp.exp(jax.lax.dot_general(zj_q, zj_k, dn, preferred_element_type=f32))

    def acc_add(row, vec_1t):
        cur = out_ref[pl.ds(row, 1), :]
        out_ref[pl.ds(row, 1), :] = cur + vec_1t

    # Row sums -> accumulator rows of block qi (fused add before the reduce).
    # The (t,1)->(1,t) relayout is a small XLU transpose; XLU/VPU have slack
    # under the EUP-bound exp work.
    row_i = jnp.transpose(jnp.sum(e_ii + e_ij, axis=1, keepdims=True))   # (1, t)
    row_j = jnp.transpose(jnp.sum(e_jj + e_ji, axis=1, keepdims=True))   # (1, t)
    acc_add(qi, row_i)
    acc_add(n_tiles + qi, row_j)

    # Column sums -> accumulator rows of block ki: by symmetry these are the
    # row sums of the mirrored lower-triangular tiles.  Skipped on diagonal
    # pairs (would double-count).
    @pl.when(ki != qi)
    def _cols():
        col_i = jnp.sum(e_ii + e_ji, axis=0, keepdims=True)              # (1, t)
        col_j = jnp.sum(e_jj + e_ij, axis=0, keepdims=True)              # (1, t)
        acc_add(ki, col_i)
        acc_add(n_tiles + ki, col_j)


def _pick_tile(B, D, itemsize, vmem_budget=32 * 1024 * 1024):
    """Square block-pair tile sized for <= ~32 MiB per-step footprint
    (v7x-safe under its 64 MiB physical VMEM; comfortable on v5e/v6e)."""
    def fits(t):
        # 4 input windows (double-buffered, matmul dtype) + 4 f32 (t,t) tiles.
        return 4 * 2 * t * D * itemsize + 4 * t * t * 4 <= vmem_budget

    for t in (512, 256, 128):
        if B % t == 0 and fits(t):
            return t
    if B > 512:
        for t in (256, 128):
            if fits(t):
                return t
    # Small / odd batches: a single zero-padded tile (multiple of 16 sublanes).
    return max(16, ((B + 15) // 16) * 16)


def contrastive_loss(emb_i, emb_j, temperature=0.5, matmul_dtype=jnp.bfloat16):
    """NT-Xent (SimCLR) loss.  emb_i, emb_j: (B, D).  Returns scalar f32."""
    B, D = emb_i.shape
    assert emb_j.shape == (B, D)
    f32 = jnp.float32

    # ---- O(B*D) prologue (hoisted out of the kernel grid) ------------------
    def normalize(x):
        # F.normalize(x, dim=1): x / max(||x||, 1e-12) == x * rsqrt(max(x.x, 1e-24))
        ss = jnp.sum(x * x, axis=1, keepdims=True)
        return x * jax.lax.rsqrt(jnp.maximum(ss, 1e-24))

    scale = float(temperature) ** -0.5          # fold 1/T symmetrically: (s*zi).(s*zj) = sim/T
    zi = normalize(emb_i.astype(f32)) * scale   # (B, D) f32
    zj = normalize(emb_j.astype(f32)) * scale

    zi_mm = zi.astype(matmul_dtype)             # streamed to the kernel (bf16 by default)
    zj_mm = zj.astype(matmul_dtype)

    t = _pick_tile(B, D, jnp.dtype(matmul_dtype).itemsize)
    n = pl.cdiv(B, t)
    b_pad = n * t
    if b_pad != B:
        pad = ((0, b_pad - B), (0, 0))
        zi_mm = jnp.pad(zi_mm, pad)             # zero rows -> each padded column adds exactly exp(0)=1
        zj_mm = jnp.pad(zj_mm, pad)

    # Upper-triangular block-pair schedule, scalar-prefetched to SMEM.
    pairs = [(q, k) for q in range(n) for k in range(q, n)]
    q_idx = jnp.asarray([q for q, _ in pairs], jnp.int32)
    k_idx = jnp.asarray([k for _, k in pairs], jnp.int32)

    kernel = functools.partial(_ntxent_denominator_kernel, n_tiles=n)

    denoms = pl.pallas_call(
        kernel,
        out_shape=jax.ShapeDtypeStruct((2 * n, t), jnp.float32),
        grid_spec=pltpu.PrefetchScalarGridSpec(
            num_scalar_prefetch=2,
            grid=(len(pairs),),
            in_specs=[
                pl.BlockSpec((t, D), lambda p, qa, ka: (qa[p], 0)),   # zi, query-side rows
                pl.BlockSpec((t, D), lambda p, qa, ka: (qa[p], 0)),   # zj, query-side rows
                pl.BlockSpec((t, D), lambda p, qa, ka: (ka[p], 0)),   # zi, key-side rows
                pl.BlockSpec((t, D), lambda p, qa, ka: (ka[p], 0)),   # zj, key-side rows
            ],
            out_specs=pl.BlockSpec((2 * n, t), lambda p, qa, ka: (0, 0)),
        ),
        compiler_params=pltpu.CompilerParams(
            # Sequential accumulation into one resident output block.
            dimension_semantics=("arbitrary",),
            # Below v7x's 64 MiB physical ceiling; above v5e/v6e scoped defaults.
            vmem_limit_bytes=48 * 1024 * 1024,
        ),
    )(q_idx, k_idx, zi_mm, zj_mm, zi_mm, zj_mm)

    # ---- O(B) epilogue ------------------------------------------------------
    denoms = denoms.reshape(2, b_pad)[:, :B]    # raw sums incl. self term + padded columns

    # Self-similarity term computed from the same rounded values the MXU saw,
    # so the subtraction cancels the kernel's diagonal contribution (near-)exactly.
    zi_r = zi_mm[:B].astype(f32)
    zj_r = zj_mm[:B].astype(f32)
    self_i = jnp.sum(zi_r * zi_r, axis=1)       # = ||z_hat||^2 / T
    self_j = jnp.sum(zj_r * zj_r, axis=1)
    pad_cols = 2.0 * (b_pad - B)                # each padded column contributed exactly 1.0

    denom_i = denoms[0] - jnp.exp(self_i) - pad_cols
    denom_j = denoms[1] - jnp.exp(self_j) - pad_cols

    # Positive pairs (already divided by T via the sqrt(1/T) folding), full f32.
    pos = jnp.sum(zi * zj, axis=1)

    loss_rows = (jnp.log(denom_i) - pos) + (jnp.log(denom_j) - pos)
    return jnp.sum(loss_rows) / (2 * B)


def _reference_loss(emb_i, emb_j, temperature=0.5):
    # Pure-JAX reference mirroring the PyTorch module.
    def normalize(x):
        return x / jnp.maximum(
            jnp.sqrt(jnp.sum(x * x, axis=1, keepdims=True)), 1e-12
        )

    B = emb_i.shape[0]
    reps = jnp.concatenate([normalize(emb_i), normalize(emb_j)], axis=0)
    sim = reps @ reps.T
    n = 2 * B
    pos = jnp.concatenate(
        [jnp.diagonal(sim, offset=B), jnp.diagonal(sim, offset=-B)], axis=0
    )
    neg_mask = 1.0 - jnp.eye(n)
    denom = jnp.sum(neg_mask * jnp.exp(sim / temperature), axis=1)
    loss_partial = -jnp.log(jnp.exp(pos / temperature) / denom)
    return jnp.sum(loss_partial) / n


if __name__ == "__main__":
    batch = 4
    hidden = 32
    key = jax.random.PRNGKey(0)
    k1, k2 = jax.random.split(key)
    emb_i = jax.random.normal(k1, (batch, hidden), dtype=jnp.float32)
    emb_j = jax.random.normal(k2, (batch, hidden), dtype=jnp.float32)

    ref = jax.block_until_ready(_reference_loss(emb_i, emb_j, temperature=0.5))

    # f32 MXU path: tight match to the f32 reference.
    loss_f32 = jax.block_until_ready(
        contrastive_loss(emb_i, emb_j, temperature=0.5, matmul_dtype=jnp.float32))
    assert jnp.allclose(loss_f32, ref, rtol=1e-4, atol=1e-4), (loss_f32, ref)

    # Default path: bf16 MXU operands (native on v5e/v6e/v7x), looser tolerance.
    loss_bf16 = jax.block_until_ready(
        contrastive_loss(emb_i, emb_j, temperature=0.5))
    assert jnp.allclose(loss_bf16, ref, rtol=3e-2, atol=3e-2), (loss_bf16, ref)

    print("KERNEL_OK")
</pallas_src>

<mosaic_0001>
module attributes {stable_mosaic.version = 11 : i64} {
  func.func @_ntxent_denominator_kernel(%arg0: i32, %arg1: memref<1xi32, #tpu.memory_space<smem>>, %arg2: memref<1xi32, #tpu.memory_space<smem>>, %arg3: memref<16x32xf32, #tpu.memory_space<vmem>>, %arg4: memref<16x32xf32, #tpu.memory_space<vmem>>, %arg5: memref<16x32xf32, #tpu.memory_space<vmem>>, %arg6: memref<16x32xf32, #tpu.memory_space<vmem>>, %arg7: memref<2x16xf32, #tpu.memory_space<vmem>>) attributes {dimension_semantics = [#tpu.dimension_semantics<arbitrary>], iteration_bounds = array<i64: 1>, scalar_prefetch = 2 : i64, scratch_operands = 0 : i64, tpu.core_type = #tpu.core_type<tc>, window_params = [{transform_indices = @transform_0, window_bounds = array<i64: 16, 32>}, {transform_indices = @transform_1, window_bounds = array<i64: 16, 32>}, {transform_indices = @transform_2, window_bounds = array<i64: 16, 32>}, {transform_indices = @transform_3, window_bounds = array<i64: 16, 32>}, {pipeline_mode = #tpu.pipeline_mode<synchronous>, transform_indices = @transform_4, window_bounds = array<i64: 2, 16>}]} {
    %0 = arith.index_cast %arg0 : i32 to index
    %1 = memref.load %arg1[%0] : memref<1xi32, #tpu.memory_space<smem>>
    %2 = arith.index_cast %arg0 : i32 to index
    %3 = memref.load %arg2[%2] : memref<1xi32, #tpu.memory_space<smem>>
    %c0_i32 = arith.constant 0 : i32
    %4 = arith.cmpi eq, %arg0, %c0_i32 : i32
    %5 = arith.extui %4 : i1 to i32
    %c0_i32_0 = arith.constant 0 : i32
    %6 = arith.cmpi ne, %5, %c0_i32_0 : i32
    scf.if %6 {
      %cst_18 = arith.constant 0.000000e+00 : f32
      %41 = vector.broadcast %cst_18 : f32 to vector<2x16xf32>
      %c0_19 = arith.constant 0 : index
      %c0_20 = arith.constant 0 : index
      %42 = vector.load %arg7[%c0_19, %c0_20] : memref<2x16xf32, #tpu.memory_space<vmem>>, vector<2x16xf32>
      tpu.vector_store %arg7[%c0_19, %c0_20], %41 {strides = array<i32>} : memref<2x16xf32, #tpu.memory_space<vmem>>, vector<2x16xf32>,
    } else {
    }
    %c0 = arith.constant 0 : index
    %c0_1 = arith.constant 0 : index
    %7 = vector.load %arg3[%c0, %c0_1] : memref<16x32xf32, #tpu.memory_space<vmem>>, vector<16x32xf32>
    %c0_2 = arith.constant 0 : index
    %c0_3 = arith.constant 0 : index
    %8 = vector.load %arg4[%c0_2, %c0_3] : memref<16x32xf32, #tpu.memory_space<vmem>>, vector<16x32xf32>
    %c0_4 = arith.constant 0 : index
    %c0_5 = arith.constant 0 : index
    %9 = vector.load %arg5[%c0_4, %c0_5] : memref<16x32xf32, #tpu.memory_space<vmem>>, vector<16x32xf32>
    %c0_6 = arith.constant 0 : index
    %c0_7 = arith.constant 0 : index
    %10 = vector.load %arg6[%c0_6, %c0_7] : memref<16x32xf32, #tpu.memory_space<vmem>>, vector<16x32xf32>
    %cst = arith.constant dense<0.000000e+00> : vector<16x16xf32>
    %11 = tpu.matmul %7, %9, %cst {dimension_numbers = #tpu.dot_dimension_numbers<[1], [1], [0], [0], [0, 0, 1, 0], [], []>} : vector<16x32xf32>, vector<16x32xf32>, vector<16x16xf32> -> vector<16x16xf32>
    %12 = math.exp %11 : vector<16x16xf32>
    %cst_8 = arith.constant dense<0.000000e+00> : vector<16x16xf32>
    %13 = tpu.matmul %7, %10, %cst_8 {dimension_numbers = #tpu.dot_dimension_numbers<[1], [1], [0], [0], [0, 0, 1, 0], [], []>} : vector<16x32xf32>, vector<16x32xf32>, vector<16x16xf32> -> vector<16x16xf32>
    %14 = math.exp %13 : vector<16x16xf32>
    %cst_9 = arith.constant dense<0.000000e+00> : vector<16x16xf32>
    %15 = tpu.matmul %8, %9, %cst_9 {dimension_numbers = #tpu.dot_dimension_numbers<[1], [1], [0], [0], [0, 0, 1, 0], [], []>} : vector<16x32xf32>, vector<16x32xf32>, vector<16x16xf32> -> vector<16x16xf32>
    %16 = math.exp %15 : vector<16x16xf32>
    %cst_10 = arith.constant dense<0.000000e+00> : vector<16x16xf32>
    %17 = tpu.matmul %8, %10, %cst_10 {dimension_numbers = #tpu.dot_dimension_numbers<[1], [1], [0], [0], [0, 0, 1, 0], [], []>} : vector<16x32xf32>, vector<16x32xf32>, vector<16x16xf32> -> vector<16x16xf32>
    %18 = math.exp %17 : vector<16x16xf32>
    %19 = arith.addf %12, %14 : vector<16x16xf32>
    %cst_11 = arith.constant dense<0.000000e+00> : vector<16xf32>
    %20 = vector.multi_reduction <add>, %19, %cst_11 [1] : vector<16x16xf32> to vector<16xf32>
    %21 = vector.shape_cast %20 : vector<16xf32> to vector<16x1xf32>
    %22 = tpu.transpose %21, [1, 0] : vector<16x1xf32> -> vector<1x16xf32>
    %23 = arith.addf %18, %16 : vector<16x16xf32>
    %cst_12 = arith.constant dense<0.000000e+00> : vector<16xf32>
    %24 = vector.multi_reduction <add>, %23, %cst_12 [1] : vector<16x16xf32> to vector<16xf32>
    %25 = vector.shape_cast %24 : vector<16xf32> to vector<16x1xf32>
    %26 = tpu.transpose %25, [1, 0] : vector<16x1xf32> -> vector<1x16xf32>
    %27 = arith.index_cast %1 : i32 to index
    %c0_13 = arith.constant 0 : index
    %28 = vector.load %arg7[%27, %c0_13] : memref<2x16xf32, #tpu.memory_space<vmem>>, vector<1x16xf32>
    %29 = arith.addf %28, %22 : vector<1x16xf32>
    %30 = arith.index_cast %1 : i32 to index
    %c0_14 = arith.constant 0 : index
    %31 = vector.load %arg7[%30, %c0_14] : memref<2x16xf32, #tpu.memory_space<vmem>>, vector<1x16xf32>
    tpu.vector_store %arg7[%30, %c0_14], %29 {strides = array<i32>} : memref<2x16xf32, #tpu.memory_space<vmem>>, vector<1x16xf32>,
    %c1_i32 = arith.constant 1 : i32
    %32 = arith.addi %c1_i32, %1 : i32
    %33 = arith.index_cast %32 : i32 to index
    %c0_15 = arith.constant 0 : index
    %34 = vector.load %arg7[%33, %c0_15] : memref<2x16xf32, #tpu.memory_space<vmem>>, vector<1x16xf32>
    %35 = arith.addf %34, %26 : vector<1x16xf32>
    %36 = arith.index_cast %32 : i32 to index
    %c0_16 = arith.constant 0 : index
    %37 = vector.load %arg7[%36, %c0_16] : memref<2x16xf32, #tpu.memory_space<vmem>>, vector<1x16xf32>
    tpu.vector_store %arg7[%36, %c0_16], %35 {strides = array<i32>} : memref<2x16xf32, #tpu.memory_space<vmem>>, vector<1x16xf32>,
    %38 = arith.cmpi ne, %3, %1 : i32
    %39 = arith.extui %38 : i1 to i32
    %c0_i32_17 = arith.constant 0 : i32
    %40 = arith.cmpi ne, %39, %c0_i32_17 : i32
    scf.if %40 {
      %41 = arith.addf %12, %16 : vector<16x16xf32>
      %cst_18 = arith.constant dense<0.000000e+00> : vector<16xf32>
      %42 = vector.multi_reduction <add>, %41, %cst_18 [0] : vector<16x16xf32> to vector<16xf32>
      %43 = vector.shape_cast %42 : vector<16xf32> to vector<1x16xf32>
      %44 = arith.addf %18, %14 : vector<16x16xf32>
      %cst_19 = arith.constant dense<0.000000e+00> : vector<16xf32>
      %45 = vector.multi_reduction <add>, %44, %cst_19 [0] : vector<16x16xf32> to vector<16xf32>
      %46 = vector.shape_cast %45 : vector<16xf32> to vector<1x16xf32>
      %47 = arith.index_cast %3 : i32 to index
      %c0_20 = arith.constant 0 : index
      %48 = vector.load %arg7[%47, %c0_20] : memref<2x16xf32, #tpu.memory_space<vmem>>, vector<1x16xf32>
      %49 = arith.addf %48, %43 : vector<1x16xf32>
      %50 = arith.index_cast %3 : i32 to index
      %c0_21 = arith.constant 0 : index
      %51 = vector.load %arg7[%50, %c0_21] : memref<2x16xf32, #tpu.memory_space<vmem>>, vector<1x16xf32>
      tpu.vector_store %arg7[%50, %c0_21], %49 {strides = array<i32>} : memref<2x16xf32, #tpu.memory_space<vmem>>, vector<1x16xf32>,
      %c1_i32_22 = arith.constant 1 : i32
      %52 = arith.addi %c1_i32_22, %3 : i32
      %53 = arith.index_cast %52 : i32 to index
      %c0_23 = arith.constant 0 : index
      %54 = vector.load %arg7[%53, %c0_23] : memref<2x16xf32, #tpu.memory_space<vmem>>, vector<1x16xf32>
      %55 = arith.addf %54, %46 : vector<1x16xf32>
      %56 = arith.index_cast %52 : i32 to index
      %c0_24 = arith.constant 0 : index
      %57 = vector.load %arg7[%56, %c0_24] : memref<2x16xf32, #tpu.memory_space<vmem>>, vector<1x16xf32>
      tpu.vector_store %arg7[%56, %c0_24], %55 {strides = array<i32>} : memref<2x16xf32, #tpu.memory_space<vmem>>, vector<1x16xf32>,
    } else {
    }
    return
  }
  func.func @transform_0(%arg0: i32, %arg1: memref<1xi32, #tpu.memory_space<smem>>, %arg2: memref<1xi32, #tpu.memory_space<smem>>) -> (i32, i32) {
    %0 = arith.index_cast %arg0 : i32 to index
    %1 = memref.load %arg1[%0] : memref<1xi32, #tpu.memory_space<smem>>
    %c0_i32 = arith.constant 0 : i32
    %c0_i32_0 = arith.constant 0 : i32
    return %1, %c0_i32 : i32, i32
  }
  func.func @transform_1(%arg0: i32, %arg1: memref<1xi32, #tpu.memory_space<smem>>, %arg2: memref<1xi32, #tpu.memory_space<smem>>) -> (i32, i32) {
    %0 = arith.index_cast %arg0 : i32 to index
    %1 = memref.load %arg1[%0] : memref<1xi32, #tpu.memory_space<smem>>
    %c0_i32 = arith.constant 0 : i32
    %c0_i32_0 = arith.constant 0 : i32
    return %1, %c0_i32 : i32, i32
  }
  func.func @transform_2(%arg0: i32, %arg1: memref<1xi32, #tpu.memory_space<smem>>, %arg2: memref<1xi32, #tpu.memory_space<smem>>) -> (i32, i32) {
    %0 = arith.index_cast %arg0 : i32 to index
    %1 = memref.load %arg2[%0] : memref<1xi32, #tpu.memory_space<smem>>
    %c0_i32 = arith.constant 0 : i32
    %c0_i32_0 = arith.constant 0 : i32
    return %1, %c0_i32 : i32, i32
  }
  func.func @transform_3(%arg0: i32, %arg1: memref<1xi32, #tpu.memory_space<smem>>, %arg2: memref<1xi32, #tpu.memory_space<smem>>) -> (i32, i32) {
    %0 = arith.index_cast %arg0 : i32 to index
    %1 = memref.load %arg2[%0] : memref<1xi32, #tpu.memory_space<smem>>
    %c0_i32 = arith.constant 0 : i32
    %c0_i32_0 = arith.constant 0 : i32
    return %1, %c0_i32 : i32, i32
  }
  func.func @transform_4(%arg0: i32, %arg1: memref<1xi32, #tpu.memory_space<smem>>, %arg2: memref<1xi32, #tpu.memory_space<smem>>) -> (i32, i32) {
    %c0_i32 = arith.constant 0 : i32
    %c0_i32_0 = arith.constant 0 : i32
    %c0_i32_1 = arith.constant 0 : i32
    return %c0_i32, %c0_i32_0 : i32, i32
  }
}

</mosaic_0001>

<bundles_post_ra>
// kernel: tpu_custom_call.1
= control target key start
LH: loop header
LB: loop body
LE: loop exit
PB: predicated region body
PF: predicated region fallthrough
CT: control target
= control target key end

     0   :  { %13 = vsyncpa [#allocation6], 0  ;;  %s750_s0 = inlined_call_operand.<no memory space> [shape: s32[1], index: 0, kind: input, shape index: {}]   ;;  %s751_s1 = inlined_call_operand.<no memory space> [shape: s32[1], index: 1, kind: input, shape index: {}]   ;;  %s752_s2 = inlined_call_operand.hbm [shape: f32[16,32], index: 2, kind: input, shape index: {}]   ;;  %s753_s3 = inlined_call_operand.hbm [shape: f32[16,32], index: 3, kind: input, shape index: {}]   ;;  %s754_s4 = inlined_call_operand.hbm [shape: f32[16,32], index: 4, kind: input, shape index: {}]   ;;  %s755_s5 = inlined_call_operand.hbm [shape: f32[16,32], index: 5, kind: input, shape index: {}]   ;;  %s756_s6 = inlined_call_operand.hbm [shape: f32[2,16], index: 6, kind: output, shape index: {}]  }
   0x1   :  { %14 = vsyncpa [#allocation9], 0 }
   0x2   :  { %15 = vsyncpa [#allocation12], 0  ;;  %s446_s23 = sshll.u32 %s750_s0, 4 }
   0x3   :  { %16 = vsyncpa [#allocation7], 0  ;;  %s41_s26 = scalar_lea.hbm %s753_s3, %s446_s23  ;;  %s602_s28 = smov [#allocation8]  }
   0x4   :  { %s42_s27 = sshll.u32 %s41_s26, 4  ;;  %s44_s29 = sshll.u32 %s602_s28, 4  ;;  %s43_s27 = int_to_ptr.hbm [resolvable:$true] %s42_s27  ;;  %s45_s29 = int_to_ptr.vmem [resolvable:$true] %s44_s29 }
   0x5   :  { %s24_s8 = scalar_lea.hbm %s752_s2, %s446_s23  ;;  %s474_s9 = sshra.s32 %s43_s27, 4  ;;  %s475_s9 = int_to_ptr.hbm [resolvable:$true] %s474_s9 }
   0x6   :  { %s476_s10 = scalar_lea.hbm %s475_s9, 16  ;;  %s478_s13 = scalar_lea.hbm %s753_s3, 16 }
   0x7   :  { %p477_p0 = scmp.ne.s32.totalorder %s475_s9, %s476_s10  ;;  %p479_p1 = scmp.lt.s32.totalorder %s475_s9, %s753_s3 }
   0x8   :  { %p480_p2 = scmp.lt.s32.totalorder %s478_s13, %s476_s10 }
   0xa   :  { %p481_p3 = por %p480_p2, %p479_p1 }
   0xc   :  { %p482_p4 = pnand %p481_p3, %p477_p0 }
   0xe   :  { %485 = shalt.err (!%p482_p4)
}
   0xf   :  { %s603_s16 = smov 128   ;;  %s604_s17 = smov 8  }
  0x10   :  { %50 = dma.hbm_to_vmem [thread:$0]  %s43_s27, 256, %s45_s29, [#allocation9], %s603_s16, %s603_s16, %s604_s17  }
  0x11   :  { %s25_s18 = sshll.u32 %s24_s8, 4  ;;  %s605_s19 = smov [#allocation5]   ;;  %s26_s18 = int_to_ptr.hbm [resolvable:$true] %s25_s18 }
  0x12   :  { %s27_s20 = sshll.u32 %s605_s19, 4  ;;  %s448_s23 = sshll.u32 %s751_s1, 4  ;;  %s28_s20 = int_to_ptr.vmem [resolvable:$true] %s27_s20 }
  0x13   :  { %s498_s3 = sshra.s32 %s26_s18, 4  ;;  %s502_s28 = scalar_lea.hbm %s752_s2, 16  ;;  %s499_s3 = int_to_ptr.hbm [resolvable:$true] %s498_s3 }
  0x14   :  { %s500_s24 = scalar_lea.hbm %s499_s3, 16  ;;  %p503_p6 = scmp.lt.s32.totalorder %s499_s3, %s752_s2 }
  0x15   :  { %p501_p5 = scmp.ne.s32.totalorder %s499_s3, %s500_s24  ;;  %p504_p7 = scmp.lt.s32.totalorder %s502_s28, %s500_s24 }
  0x17   :  { %p505_p8 = por %p504_p7, %p503_p6 }
  0x19   :  { %p506_p9 = pnand %p505_p8, %p501_p5 }
  0x1b   :  { %509 = shalt.err (!%p506_p9)
}
  0x1c   :  { %33 = dma.hbm_to_vmem [thread:$0]  %s26_s18, 256, %s28_s20, [#allocation6], %s603_s16, %s603_s16, %s604_s17  }
  0x1d   :  { %s58_s10 = scalar_lea.hbm %s754_s4, %s448_s23  ;;  %s606_s12 = smov [#allocation10]  }
  0x1e   :  { %s59_s11 = sshll.u32 %s58_s10, 4  ;;  %s61_s13 = sshll.u32 %s606_s12, 4  ;;  %s60_s11 = int_to_ptr.hbm [resolvable:$true] %s59_s11  ;;  %s62_s13 = int_to_ptr.vmem [resolvable:$true] %s61_s13 }
  0x1f   :  { %s522_s2 = sshra.s32 %s60_s11, 4  ;;  %s526_s18 = scalar_lea.hbm %s754_s4, 16  ;;  %s523_s2 = int_to_ptr.hbm [resolvable:$true] %s522_s2 }
  0x20   :  { %s524_s14 = scalar_lea.hbm %s523_s2, 16  ;;  %p527_p11 = scmp.lt.s32.totalorder %s523_s2, %s754_s4 }
  0x21   :  { %p525_p10 = scmp.ne.s32.totalorder %s523_s2, %s524_s14  ;;  %p528_p12 = scmp.lt.s32.totalorder %s526_s18, %s524_s14 }
  0x23   :  { %p529_p13 = por %p528_p12, %p527_p11 }
  0x25   :  { %p530_p0 = pnand %p529_p13, %p525_p10 }
  0x27   :  { %533 = shalt.err (!%p530_p0)
}
  0x28   :  { %67 = dma.hbm_to_vmem [thread:$0]  %s60_s11, 256, %s62_s13, [#allocation9], %s603_s16, %s603_s16, %s604_s17  }
  0x29   :  { %s75_s26 = scalar_lea.hbm %s755_s5, %s448_s23  ;;  %s607_s30 = smov [#allocation11]  }
  0x2a   :  { %s76_s28 = sshll.u32 %s75_s26, 4  ;;  %s78_s7 = sshll.u32 %s607_s30, 4  ;;  %s77_s28 = int_to_ptr.hbm [resolvable:$true] %s76_s28  ;;  %s79_s7 = int_to_ptr.vmem [resolvable:$true] %s78_s7 }
  0x2b   :  { %s546_s4 = sshra.s32 %s77_s28, 4  ;;  %s550_s9 = scalar_lea.hbm %s755_s5, 16  ;;  %s547_s4 = int_to_ptr.hbm [resolvable:$true] %s546_s4 }
  0x2c   :  { %s548_s27 = scalar_lea.hbm %s547_s4, 16  ;;  %p551_p2 = scmp.lt.s32.totalorder %s547_s4, %s755_s5 }
  0x2d   :  { %p549_p1 = scmp.ne.s32.totalorder %s547_s4, %s548_s27  ;;  %p552_p3 = scmp.lt.s32.totalorder %s550_s9, %s548_s27 }
  0x2f   :  { %p553_p4 = por %p552_p3, %p551_p2 }
  0x31   :  { %p554_p5 = pnand %p553_p4, %p549_p1 }
  0x33   :  { %557 = shalt.err (!%p554_p5)
}
  0x34   :  { %84 = dma.hbm_to_vmem [thread:$0]  %s77_s28, 256, %s79_s7, [#allocation12], %s603_s16, %s603_s16, %s604_s17  }
  0x35   :  { %594 = dma.done.wait [#allocation6], 256  }
  0x36   :  { %595 = vsyncadd [#allocation6], 4294967040 }
  0x37   :  { %596 = dma.done.wait [#allocation9], 512  }
  0x38   :  { %597 = vsyncadd [#allocation9], 4294966784 }
  0x39   :  { %598 = dma.done.wait [#allocation12], 256  }
  0x3a   :  { %599 = vsyncadd [#allocation12], 4294967040  ;;  %vm125_vm0 = vcmask 261120   ;;  %v122_v0 = vld [vmem:[#allocation10 + $0x8] sm:$0xff]  ;;  %v124_v1 = vld [vmem:[#allocation11 + $0x8] sm:$0xff]  ;;  %vm260_vm1 = vcmask 130048   ;;  %p443_p6 = scmp.eq.s32.totalorder %s751_s1, %s750_s0 }
  0x3b   :  { %433 = vmatpush.xpose.msk.msra.mxu2 %vm125_vm0, %v122_v0  ;;  %437 = vmatpush.xpose.msk.msra.mxu3 %vm125_vm0, %v124_v1  ;;  %v121_v2 = vld [vmem:[#allocation10] sm:$0xff]  ;;  %v123_v3 = vld [vmem:[#allocation11] sm:$0xff]  ;;  %v120_v6 = vld [vmem:[#allocation8 + $0x8] sm:$0xff]  ;;  %vm115_vm2 = vcmask 123904   ;;  %v608_v40 = vmov 0.0   ;;  %s339_s17 = scalar_lea.vmem [#allocation13], %s750_s0 }
  0x3c   :  { %425 = vmatpush.xpose.msk.msra.mxu0 %vm125_vm0, %v122_v0  ;;  %429 = vmatpush.xpose.msk.msra.mxu1 %vm125_vm0, %v124_v1  ;;  %v119_v4 = vld [vmem:[#allocation8] sm:$0xff]  ;;  %v117_v5 = vld [vmem:[#allocation5] sm:$0xff]  ;;  %v118_v7 = vld [vmem:[#allocation5 + $0x8] sm:$0xff]  ;;  %116 = vst.msk [vmem:[#allocation13] sm:$0x3] %vm115_vm2, %v608_v40  ;;  %vm342_vm3 = vcmask 122880  }
  0x3d   :  { %s375_s15 = scalar_lea.vmem (!%p443_p6), [#allocation13], %s751_s1 }
  0x3f   :  { %434 = vmatpush.xpose.msk.msra.mxu2 %vm125_vm0, %v121_v2  ;;  %438 = vmatpush.xpose.msk.msra.mxu3 %vm125_vm0, %v123_v3 }
  0x40   :  { %426 = vmatpush.xpose.msk.msra.mxu0 %vm125_vm0, %v121_v2  ;;  %430 = vmatpush.xpose.msk.msra.mxu1 %vm125_vm0, %v123_v3 }
  0x42   :  { %435 = vmatmul.msk.f32.vlgmr.msra.gmra.mxu2 %vm125_vm0, %v119_v4  ;;  %439 = vmatmul.msk.f32.vlgmr.msra.gmra.mxu3 %vm125_vm0, %v119_v4 }
  0x43   :  { %427 = vmatmul.msk.f32.vlgmr.msra.gmra.mxu0 %vm125_vm0, %v117_v5  ;;  %431 = vmatmul.msk.f32.vlgmr.msra.gmra.mxu1 %vm125_vm0, %v117_v5  ;;  %v340_v45 = vld [vmem:[%s339_s17] sm:$0x1]  ;;  %v441_v48 = vld [vmem:[%s339_s17 + $0x1] sm:$0x1] }
  0x4a   :  { %436 = vmatmul.msk.f32.gmra.mxu2 %vm125_vm0, %v120_v6  ;;  %440 = vmatmul.msk.f32.gmra.mxu3 %vm125_vm0, %v120_v6 }
  0x4b   :  { %428 = vmatmul.msk.f32.gmra.mxu0 %vm125_vm0, %v118_v7  ;;  %432 = vmatmul.msk.f32.gmra.mxu1 %vm125_vm0, %v118_v7 }
  0xc0   :  { %v155_v8 = vpop.f32.mrf.mxu0  ;;  %v188_v9 = vpop.f32.mrf.mxu1 }
  0xc1   :  { %v161_v10 = vmul.f32 1.442695, %v155_v8  ;;  %v194_v11 = vmul.f32 1.442695, %v188_v9 }
  0xc3   :  { %458 = vpow2.f32 %v161_v10 }
  0xc4   :  { %460 = vpow2.f32 %v194_v11 }
  0xc5   :  { %v221_v12 = vpop.f32.mrf.mxu2  ;;  %v248_v13 = vpop.f32.mrf.mxu3 }
  0xc6   :  { %v227_v14 = vmul.f32 1.442695, %v221_v12  ;;  %v254_v15 = vmul.f32 1.442695, %v248_v13 }
  0xc8   :  { %462 = vpow2.f32 %v227_v14  ;;  %v158_v16 = vpop.f32.mrf.mxu0  ;;  %v191_v17 = vpop.f32.mrf.mxu1 }
  0xc9   :  { %v459_v18 = vpop.eup %458  ;;  %464 = vpow2.f32 %v254_v15  ;;  %v163_v19 = vmul.f32 1.442695, %v158_v16  ;;  %v196_v20 = vmul.f32 1.442695, %v191_v17 }
  0xca   :  { %v461_v21 = vpop.eup %460 }
  0xcb   :  { %466 = vpow2.f32 %v163_v19  ;;  %v258_v22 = vadd.f32 %v461_v21, %v459_v18 }
  0xcc   :  { %468 = vpow2.f32 %v196_v20 }
  0xcd   :  { %v224_v23 = vpop.f32.mrf.mxu2  ;;  %v251_v24 = vpop.f32.mrf.mxu3  ;;  %v261_v25 = vsel %vm260_vm1, %v258_v22, 0.0 }
  0xce   :  { %v463_v26 = vpop.eup %462  ;;  %v229_v27 = vmul.f32 1.442695, %v224_v23  ;;  %v256_v28 = vmul.f32 1.442695, %v251_v24  ;;  %262 = vadd.xlane.f32.xlu0 %v261_v25 }
  0xcf   :  { %v465_v29 = vpop.eup %464 }
  0xd0   :  { %470 = vpow2.f32 %v229_v27  ;;  %v299_v30 = vadd.f32 %v465_v29, %v463_v26 }
  0xd1   :  { %v467_v31 = vpop.eup %466  ;;  %472 = vpow2.f32 %v256_v28 }
  0xd2   :  { %v469_v32 = vpop.eup %468  ;;  %v301_v33 = vsel %vm260_vm1, %v299_v30, 0.0 }
  0xd3   :  { %302 = vadd.xlane.f32.xlu2 %v301_v33  ;;  %v259_v34 = vadd.f32 %v469_v32, %v467_v31 }
  0xd5   :  { %v264_v35 = vsel %vm260_vm1, %v259_v34, 0.0 }
  0xd6   :  { %v471_v36 = vpop.eup %470  ;;  %265 = vadd.xlane.f32.xlu0 %v264_v35 }
  0xd7   :  { %v473_v37 = vpop.eup %472 }
  0xd8   :  { %v300_v38 = vadd.f32 %v473_v37, %v471_v36 }
  0xda   :  { %v304_v39 = vsel %vm260_vm1, %v300_v38, 0.0 }
  0xdb   :  { %305 = vadd.xlane.f32.xlu2 %v304_v39 }
 0x141   :  { %v263_v41 = vpop.xlane.xlu0 %262 }
 0x142   :  { %267 = vxpose.xlu1.b32.start [1/2] (short) (narrow) %v263_v41, 8 }
 0x146   :  { %v303_v42 = vpop.xlane.xlu2 %302 }
 0x147   :  { %307 = vxpose.xlu0.b32.start [1/2] (short) (narrow) %v303_v42, 8 }
 0x149   :  { %v266_v43 = vpop.xlane.xlu0 %265 }
 0x14a   :  { %268 = vxpose.xlu1.b32.end [2/2] (short) (narrow) %v266_v43, 8 }
 0x14e   :  { %v306_v44 = vpop.xlane.xlu2 %305 }
 0x14f   :  { %308 = vxpose.xlu0.b32.end [2/2] (short) (narrow) %v306_v44, 8 }
 0x1e6   :  { %v283_v46 = vpop.trf.xlu1 }
 0x1e7   :  { %v341_v47 = vadd.f32 %v340_v45, %v283_v46 }
 0x1e9   :  { %343 = vst.msk [vmem:[%s339_s17] sm:$0x1] %vm342_vm3, %v341_v47 }
 0x1ea   :  { %352 = sbr.rel (%p443_p6) target bundleno = 516 (0x204), region = 41 }
 0x1eb   :  { %v323_v49 = vpop.trf.xlu0 }
 0x1ec   :  { %v347_v50 = vadd.f32 %v441_v48, %v323_v49 }
 0x1ee   :  { %442 = vst.msk [vmem:[%s339_s17 + $0x1] sm:$0x1] %vm342_vm3, %v347_v50 }
 0x1ef   :  { %v353_v51 = vadd.f32 %v463_v26, %v459_v18  ;;  %v354_v52 = vadd.f32 %v471_v36, %v467_v31  ;;  %v364_v53 = vadd.f32 %v465_v29, %v461_v21  ;;  %v365_v54 = vadd.f32 %v473_v37, %v469_v32 }
 0x1f1   :  { %v355_v55 = vsel %vm260_vm1, %v353_v51, 0.0  ;;  %v356_v56 = vsel %vm260_vm1, %v354_v52, 0.0  ;;  %v366_v57 = vsel %vm260_vm1, %v364_v53, 0.0  ;;  %v367_v58 = vsel %vm260_vm1, %v365_v54, 0.0 }
 0x1f2   :  { %v357_v59 = vadd.f32 %v356_v56, %v355_v55  ;;  %v368_v60 = vadd.f32 %v367_v58, %v366_v57 }
 0x1f4   :  { %v358_v61 = vrot.slane %v357_v59, 4  ;;  %v369_v62 = vrot.slane %v368_v60, 4 }
 0x1f5   :  { %v376_v7 = vld [vmem:[%s375_s15] sm:$0x1]  ;;  %v444_v8 = vld [vmem:[%s375_s15 + $0x1] sm:$0x1] }
 0x1f6   :  { %v359_v63 = vadd.f32 %v358_v61, %v357_v59  ;;  %v370_v0 = vadd.f32 %v369_v62, %v368_v60 }
 0x1f8   :  { %v360_v1 = vrot.slane %v359_v63, 2  ;;  %v371_v2 = vrot.slane %v370_v0, 2 }
 0x1fa   :  { %v361_v3 = vadd.f32 %v360_v1, %v359_v63  ;;  %v372_v4 = vadd.f32 %v371_v2, %v370_v0 }
 0x1fc   :  { %v362_v5 = vrot.slane %v361_v3, 1  ;;  %v373_v6 = vrot.slane %v372_v4, 1 }
 0x1fe   :  { %v363_v9 = vadd.f32 %v362_v5, %v361_v3  ;;  %v374_v10 = vadd.f32 %v373_v6, %v372_v4 }
 0x200   :  { %v377_v11 = vadd.f32 %v376_v7, %v363_v9  ;;  %v382_v12 = vadd.f32 %v444_v8, %v374_v10 }
 0x202   :  { %378 = vst.msk [vmem:[%s375_s15] sm:$0x1] %vm342_vm3, %v377_v11 }
 0x203   :  { %445 = vst.msk [vmem:[%s375_s15 + $0x1] sm:$0x1] %vm342_vm3, %v382_v12 }
 0x204 PF:  { %s391_s20 = sshll.u32 %s756_s6, 4  ;;  %s609_s21 = smov [#allocation13]   ;;  %s392_s20 = int_to_ptr.hbm [resolvable:$true] %s391_s20 }
 0x205   :  { %s389_s22 = sshll.u32 %s609_s21, 4  ;;  %s390_s22 = int_to_ptr.vmem [resolvable:$true] %s389_s22 }
 0x206   :  { %394 = dma.vmem_to_hbm [thread:$0]  %s390_s22, 32, %s392_s20, [#allocation7]  }
 0x207   :  { %600 = dma.done.wait [#allocation7], 32  }
 0x208   :  { %601 = vsyncadd [#allocation7], 4294967264 }
 0x209   :  { %399 = vsyncpa [#allocation6], 1 }
 0x20a   :  { %400 = vsyncpa [#allocation9], 1 }
 0x20b   :  { %401 = vsyncpa [#allocation12], 1 }
 0x20c   :  { %402 = vsyncpa [#allocation7], 1 }

</bundles_post_ra>
